<compile_context>
chip_gen: v6e
topology: v6e:2x2x1
jax: 0.10.0
libtpu: 0.0.40
codegen_flags: <defaults>
</compile_context>

<pallas_src>
import jax
import jax.numpy as jnp
from jax.experimental import pallas as pl
from jax.experimental.pallas import tpu as pltpu

EPS = 1e-5
FEAT = 128   # every hidden feature dim is zero-padded to this lane width
N_OUT = 2    # real logits


# ----------------------------- kernel ---------------------------------------
def guide_net_kernel(x_ref, w1_ref, wr_ref, b_ref, o_ref):
    """One batch tile per grid step; all (folded, packed) weights resident.

    x_ref : (tb, C)            input tile (cast to the weight dtype for the MXU)
    w1_ref: (C, FEAT)          input_layer weight (BN1 folded, out-dim padded)
    wr_ref: (4, FEAT, FEAT)    dense1..dense3 (+BN folded) and `out` weights
    b_ref : (5, FEAT)          folded biases (f32), one row per layer
    o_ref : (tb, N_OUT)        logits (narrow output -> 64x less HBM writeback)
    """
    cdt = w1_ref.dtype  # compute dtype for the MXU (bf16 default, or f32)

    h = x_ref[...].astype(cdt)
    # input_layer + bn1 + relu
    h = jnp.dot(h, w1_ref[...], preferred_element_type=jnp.float32) + b_ref[0:1, :]
    h = jnp.maximum(h, 0.0)
    # dense1 + bn2 + relu ; dense2 + bn3 + relu ; (dropout eval = id) ; dense3 + bn4 + relu
    for l in range(3):
        h = jnp.dot(h.astype(cdt), wr_ref[l],
                    preferred_element_type=jnp.float32) + b_ref[l + 1:l + 2, :]
        h = jnp.maximum(h, 0.0)
    # out (no BN / relu); keep only the 2 real logit columns
    logits = jnp.dot(h.astype(cdt), wr_ref[3],
                     preferred_element_type=jnp.float32) + b_ref[4:5, :]
    o_ref[...] = logits[:, :N_OUT]


# ----------------------------- wrapper ---------------------------------------
def guide_net(x, w1, w_rest, biases, *, tile_b=4096):
    """x: (B, C) float32/bfloat16.  Returns (B, 2) float32 logits."""
    B, C = x.shape

    # Native sublane tile for the input activations: 8 rows (32-bit) / 16 (bf16).
    sub = 8 if x.dtype.itemsize >= 4 else 16
    b_pad = pl.cdiv(B, sub) * sub

    # Batch tile: big (default 4096 rows) to amortize per-step overhead, but
    # split into >=2 grid steps when possible so v7x's two TCs both get work.
    min_tiles = 2 if b_pad >= 2 * sub else 1
    tb = min(tile_b, pl.cdiv(b_pad, min_tiles))
    tb = pl.cdiv(tb, sub) * sub
    B_pad = pl.cdiv(B, tb) * tb
    if B_pad != B:
        x = jnp.pad(x, ((0, B_pad - B), (0, 0)))
    grid = (B_pad // tb,)

    out = pl.pallas_call(
        guide_net_kernel,
        out_shape=jax.ShapeDtypeStruct((B_pad, N_OUT), jnp.float32),
        grid_spec=pltpu.PrefetchScalarGridSpec(
            num_scalar_prefetch=0,
            grid=grid,
            in_specs=[
                pl.BlockSpec((tb, C), lambda i: (i, 0)),
                pl.BlockSpec(w1.shape, lambda i: (0, 0)),          # resident
                pl.BlockSpec(w_rest.shape, lambda i: (0, 0, 0)),   # resident
                pl.BlockSpec(biases.shape, lambda i: (0, 0)),      # resident
            ],
            # Narrow output block: last dim (2) equals the full array dim -> legal.
            out_specs=pl.BlockSpec((tb, N_OUT), lambda i: (i, 0)),
        ),
        compiler_params=pltpu.CompilerParams(
            dimension_semantics=("parallel",),
            vmem_limit_bytes=32 * 1024 * 1024),
    )(x, w1, w_rest, biases)
    return out if B_pad == B else out[:B]


# --------------------- host-side BN folding + packing ------------------------
def fold_and_pack(params, dtype=jnp.bfloat16):
    """Fold eval-mode BatchNorm into the linears and zero-pad/pack:
       returns (w1 [C, FEAT], w_rest [4, FEAT, FEAT], biases [5, FEAT])."""
    p = list(params)
    ws, bs = [], []
    for li in range(5):
        w, b = p[:2]; p = p[2:]
        b = b[0]
        if li < 4:  # BN after the first 4 linears
            g, be, m, v = [q[0] for q in p[:4]]; p = p[4:]
            scale = g * jax.lax.rsqrt(v + EPS)
            w = w * scale[None, :]
            b = (b - m) * scale + be
        ws.append(w); bs.append(b)

    def pad_w(w, din_p, dout_p):
        din, dout = w.shape
        return jnp.pad(w, ((0, din_p - din), (0, dout_p - dout)))

    C = ws[0].shape[0]
    w1 = pad_w(ws[0], C, FEAT).astype(dtype)
    w_rest = jnp.stack([pad_w(w, FEAT, FEAT) for w in ws[1:]]).astype(dtype)
    biases = jnp.stack([jnp.pad(b, (0, FEAT - b.shape[0])) for b in bs]
                       ).astype(jnp.float32)
    return w1, w_rest, biases


# --------------------- synthetic params + pure-JAX reference -----------------
def make_params(channels_in, key):
    """Deterministic synthetic parameters (same shapes as the torch module;
    linear weights stored pre-transposed as [in, out])."""
    dims = [(channels_in, 8), (8, 16), (16, 32), (32, 16), (16, 2)]
    params = []
    keys = jax.random.split(key, 64)
    ki = 0
    for li, (din, dout) in enumerate(dims):
        w = jax.random.normal(keys[ki], (din, dout), jnp.float32) * 0.2; ki += 1
        b = jax.random.normal(keys[ki], (1, dout), jnp.float32) * 0.1;  ki += 1
        params += [w, b]
        if li < 4:
            g = 1.0 + 0.1 * jax.random.normal(keys[ki], (1, dout), jnp.float32); ki += 1
            be = 0.1 * jax.random.normal(keys[ki], (1, dout), jnp.float32);      ki += 1
            m = 0.1 * jax.random.normal(keys[ki], (1, dout), jnp.float32);       ki += 1
            v = jnp.abs(jax.random.normal(keys[ki], (1, dout), jnp.float32)) + 0.5; ki += 1
            params += [g, be, m, v]
    return params


def ref_forward(x, params):
    """Pure-JAX reference of the eval-mode torch forward (unfolded BN)."""
    p = list(params)
    h = x
    for _ in range(4):
        w, b, g, be, m, v = p[:6]; p = p[6:]
        h = h @ w + b
        h = (h - m) * (g / jnp.sqrt(v + EPS)) + be
        h = jnp.maximum(h, 0.0)
    w, b = p
    return h @ w + b


# ------------------------------------ main ------------------------------------
if __name__ == "__main__":
    channels_in = 4
    batch = 16

    key = jax.random.PRNGKey(0)
    kx, kp = jax.random.split(key)
    x = jax.random.normal(kx, (batch, channels_in), jnp.float32)
    params = make_params(channels_in, kp)
    expected = ref_forward(x, params)

    # Default bf16 MXU path (f32 accumulation) — exercises the 2-step grid.
    w1, wr, bs = fold_and_pack(params)  # bf16 weights
    out = jax.block_until_ready(guide_net(x, w1, wr, bs))
    assert out.shape == (batch, 2)
    assert jnp.allclose(out, expected, atol=1e-1, rtol=1e-1), "bf16 mismatch vs reference"

    # f32 compute path (tight check against the unfolded reference).
    w1f, wrf, bsf = fold_and_pack(params, dtype=jnp.float32)
    out_f32 = jax.block_until_ready(guide_net(x, w1f, wrf, bsf))
    assert out_f32.shape == (batch, 2)
    assert jnp.allclose(out_f32, expected, atol=1e-4, rtol=1e-4), "f32 mismatch vs reference"

    # bf16 activations in HBM (exercises the 16-row sublane padding path).
    out_bf = jax.block_until_ready(guide_net(x.astype(jnp.bfloat16), w1, wr, bs))
    assert out_bf.shape == (batch, 2)
    assert jnp.allclose(out_bf, expected, atol=1e-1, rtol=1e-1), "bf16-input mismatch vs reference"

    print("KERNEL_OK")
</pallas_src>

<mosaic_0001>
module attributes {stable_mosaic.version = 11 : i64} {
  func.func @guide_net_kernel(%arg0: i32, %arg1: memref<8x4xf32, #tpu.memory_space<vmem>>, %arg2: memref<4x128xbf16, #tpu.memory_space<vmem>>, %arg3: memref<4x128x128xbf16, #tpu.memory_space<vmem>>, %arg4: memref<5x128xf32, #tpu.memory_space<vmem>>, %arg5: memref<8x2xf32, #tpu.memory_space<vmem>>) attributes {dimension_semantics = [#tpu.dimension_semantics<parallel>], iteration_bounds = array<i64: 2>, scalar_prefetch = 0 : i64, scratch_operands = 0 : i64, tpu.core_type = #tpu.core_type<tc>, window_params = [{transform_indices = @transform_0, window_bounds = array<i64: 8, 4>}, {pipeline_mode = #tpu.pipeline_mode<synchronous>, transform_indices = @transform_1, window_bounds = array<i64: 4, 128>}, {pipeline_mode = #tpu.pipeline_mode<synchronous>, transform_indices = @transform_2, window_bounds = array<i64: 4, 128, 128>}, {pipeline_mode = #tpu.pipeline_mode<synchronous>, transform_indices = @transform_3, window_bounds = array<i64: 5, 128>}, {transform_indices = @transform_4, window_bounds = array<i64: 8, 2>}]} {
    %c0 = arith.constant 0 : index
    %c0_0 = arith.constant 0 : index
    %0 = vector.load %arg1[%c0, %c0_0] : memref<8x4xf32, #tpu.memory_space<vmem>>, vector<8x4xf32>
    %1 = arith.truncf %0 : vector<8x4xf32> to vector<8x4xbf16>
    %c0_1 = arith.constant 0 : index
    %c0_2 = arith.constant 0 : index
    %2 = vector.load %arg2[%c0_1, %c0_2] : memref<4x128xbf16, #tpu.memory_space<vmem>>, vector<4x128xbf16>
    %cst = arith.constant dense<0.000000e+00> : vector<8x128xf32>
    %3 = tpu.matmul %1, %2, %cst {dimension_numbers = #tpu.dot_dimension_numbers<[1], [0], [0], [1], [0, 0, 1, 1], [], []>} : vector<8x4xbf16>, vector<4x128xbf16>, vector<8x128xf32> -> vector<8x128xf32>
    %c0_3 = arith.constant 0 : index
    %c0_4 = arith.constant 0 : index
    %4 = vector.load %arg4[%c0_3, %c0_4] : memref<5x128xf32, #tpu.memory_space<vmem>>, vector<1x128xf32>
    %5 = vector.broadcast %4 : vector<1x128xf32> to vector<8x128xf32>
    %6 = arith.addf %3, %5 : vector<8x128xf32>
    %cst_5 = arith.constant 0.000000e+00 : f32
    %7 = vector.broadcast %cst_5 : f32 to vector<8x128xf32>
    %8 = arith.maximumf %6, %7 : vector<8x128xf32>
    %9 = arith.truncf %8 : vector<8x128xf32> to vector<8x128xbf16>
    %c0_6 = arith.constant 0 : index
    %c0_7 = arith.constant 0 : index
    %c0_8 = arith.constant 0 : index
    %10 = vector.load %arg3[%c0_6, %c0_7, %c0_8] : memref<4x128x128xbf16, #tpu.memory_space<vmem>>, vector<1x128x128xbf16>
    %11 = vector.shape_cast %10 : vector<1x128x128xbf16> to vector<128x128xbf16>
    %cst_9 = arith.constant dense<0.000000e+00> : vector<8x128xf32>
    %12 = tpu.matmul %9, %11, %cst_9 {dimension_numbers = #tpu.dot_dimension_numbers<[1], [0], [0], [1], [0, 0, 1, 1], [], []>} : vector<8x128xbf16>, vector<128x128xbf16>, vector<8x128xf32> -> vector<8x128xf32>
    %c1 = arith.constant 1 : index
    %c0_10 = arith.constant 0 : index
    %13 = vector.load %arg4[%c1, %c0_10] : memref<5x128xf32, #tpu.memory_space<vmem>>, vector<1x128xf32>
    %14 = vector.broadcast %13 : vector<1x128xf32> to vector<8x128xf32>
    %15 = arith.addf %12, %14 : vector<8x128xf32>
    %cst_11 = arith.constant 0.000000e+00 : f32
    %16 = vector.broadcast %cst_11 : f32 to vector<8x128xf32>
    %17 = arith.maximumf %15, %16 : vector<8x128xf32>
    %18 = arith.truncf %17 : vector<8x128xf32> to vector<8x128xbf16>
    %c1_12 = arith.constant 1 : index
    %c0_13 = arith.constant 0 : index
    %c0_14 = arith.constant 0 : index
    %19 = vector.load %arg3[%c1_12, %c0_13, %c0_14] : memref<4x128x128xbf16, #tpu.memory_space<vmem>>, vector<1x128x128xbf16>
    %20 = vector.shape_cast %19 : vector<1x128x128xbf16> to vector<128x128xbf16>
    %cst_15 = arith.constant dense<0.000000e+00> : vector<8x128xf32>
    %21 = tpu.matmul %18, %20, %cst_15 {dimension_numbers = #tpu.dot_dimension_numbers<[1], [0], [0], [1], [0, 0, 1, 1], [], []>} : vector<8x128xbf16>, vector<128x128xbf16>, vector<8x128xf32> -> vector<8x128xf32>
    %c2 = arith.constant 2 : index
    %c0_16 = arith.constant 0 : index
    %22 = vector.load %arg4[%c2, %c0_16] : memref<5x128xf32, #tpu.memory_space<vmem>>, vector<1x128xf32>
    %23 = vector.broadcast %22 : vector<1x128xf32> to vector<8x128xf32>
    %24 = arith.addf %21, %23 : vector<8x128xf32>
    %cst_17 = arith.constant 0.000000e+00 : f32
    %25 = vector.broadcast %cst_17 : f32 to vector<8x128xf32>
    %26 = arith.maximumf %24, %25 : vector<8x128xf32>
    %27 = arith.truncf %26 : vector<8x128xf32> to vector<8x128xbf16>
    %c2_18 = arith.constant 2 : index
    %c0_19 = arith.constant 0 : index
    %c0_20 = arith.constant 0 : index
    %28 = vector.load %arg3[%c2_18, %c0_19, %c0_20] : memref<4x128x128xbf16, #tpu.memory_space<vmem>>, vector<1x128x128xbf16>
    %29 = vector.shape_cast %28 : vector<1x128x128xbf16> to vector<128x128xbf16>
    %cst_21 = arith.constant dense<0.000000e+00> : vector<8x128xf32>
    %30 = tpu.matmul %27, %29, %cst_21 {dimension_numbers = #tpu.dot_dimension_numbers<[1], [0], [0], [1], [0, 0, 1, 1], [], []>} : vector<8x128xbf16>, vector<128x128xbf16>, vector<8x128xf32> -> vector<8x128xf32>
    %c3 = arith.constant 3 : index
    %c0_22 = arith.constant 0 : index
    %31 = vector.load %arg4[%c3, %c0_22] : memref<5x128xf32, #tpu.memory_space<vmem>>, vector<1x128xf32>
    %32 = vector.broadcast %31 : vector<1x128xf32> to vector<8x128xf32>
    %33 = arith.addf %30, %32 : vector<8x128xf32>
    %cst_23 = arith.constant 0.000000e+00 : f32
    %34 = vector.broadcast %cst_23 : f32 to vector<8x128xf32>
    %35 = arith.maximumf %33, %34 : vector<8x128xf32>
    %36 = arith.truncf %35 : vector<8x128xf32> to vector<8x128xbf16>
    %c3_24 = arith.constant 3 : index
    %c0_25 = arith.constant 0 : index
    %c0_26 = arith.constant 0 : index
    %37 = vector.load %arg3[%c3_24, %c0_25, %c0_26] : memref<4x128x128xbf16, #tpu.memory_space<vmem>>, vector<1x128x128xbf16>
    %38 = vector.shape_cast %37 : vector<1x128x128xbf16> to vector<128x128xbf16>
    %cst_27 = arith.constant dense<0.000000e+00> : vector<8x128xf32>
    %39 = tpu.matmul %36, %38, %cst_27 {dimension_numbers = #tpu.dot_dimension_numbers<[1], [0], [0], [1], [0, 0, 1, 1], [], []>} : vector<8x128xbf16>, vector<128x128xbf16>, vector<8x128xf32> -> vector<8x128xf32>
    %c4 = arith.constant 4 : index
    %c0_28 = arith.constant 0 : index
    %40 = vector.load %arg4[%c4, %c0_28] : memref<5x128xf32, #tpu.memory_space<vmem>>, vector<1x128xf32>
    %41 = vector.broadcast %40 : vector<1x128xf32> to vector<8x128xf32>
    %42 = arith.addf %39, %41 : vector<8x128xf32>
    %43 = vector.extract_strided_slice %42 {offsets = [0, 0], sizes = [8, 2], strides = [1, 1]} : vector<8x128xf32> to vector<8x2xf32>
    %c0_29 = arith.constant 0 : index
    %c0_30 = arith.constant 0 : index
    %44 = vector.load %arg5[%c0_29, %c0_30] : memref<8x2xf32, #tpu.memory_space<vmem>>, vector<8x2xf32>
    tpu.vector_store %arg5[%c0_29, %c0_30], %43 {strides = array<i32>} : memref<8x2xf32, #tpu.memory_space<vmem>>, vector<8x2xf32>,
    return
  }
  func.func @transform_0(%arg0: i32) -> (i32, i32) {
    %c0_i32 = arith.constant 0 : i32
    %c0_i32_0 = arith.constant 0 : i32
    return %arg0, %c0_i32 : i32, i32
  }
  func.func @transform_1(%arg0: i32) -> (i32, i32) {
    %c0_i32 = arith.constant 0 : i32
    %c0_i32_0 = arith.constant 0 : i32
    %c0_i32_1 = arith.constant 0 : i32
    return %c0_i32, %c0_i32_0 : i32, i32
  }
  func.func @transform_2(%arg0: i32) -> (i32, i32, i32) {
    %c0_i32 = arith.constant 0 : i32
    %c0_i32_0 = arith.constant 0 : i32
    %c0_i32_1 = arith.constant 0 : i32
    %c0_i32_2 = arith.constant 0 : i32
    return %c0_i32, %c0_i32_0, %c0_i32_1 : i32, i32, i32
  }
  func.func @transform_3(%arg0: i32) -> (i32, i32) {
    %c0_i32 = arith.constant 0 : i32
    %c0_i32_0 = arith.constant 0 : i32
    %c0_i32_1 = arith.constant 0 : i32
    return %c0_i32, %c0_i32_0 : i32, i32
  }
  func.func @transform_4(%arg0: i32) -> (i32, i32) {
    %c0_i32 = arith.constant 0 : i32
    %c0_i32_0 = arith.constant 0 : i32
    return %arg0, %c0_i32 : i32, i32
  }
}

</mosaic_0001>

<bundles_post_ra>
// kernel: tpu_custom_call.1
= control target key start
LH: loop header
LB: loop body
LE: loop exit
PB: predicated region body
PF: predicated region fallthrough
CT: control target
= control target key end

     0   :  { %9 = vsyncpa [#allocation3], 0  ;;  %s1075_s15 = smov 0   ;;  %s1182_s0 = inlined_call_operand.vmem [shape: f32[16,4], index: 0, kind: input, shape index: {}]   ;;  %s1183_s1 = inlined_call_operand.vmem [shape: bf16[4,128], index: 1, kind: input, shape index: {}]   ;;  %s1184_s2 = inlined_call_operand.hbm [shape: bf16[4,128,128], index: 2, kind: input, shape index: {}]   ;;  %s1185_s3 = inlined_call_operand.vmem [shape: f32[5,128], index: 3, kind: input, shape index: {}]   ;;  %s1186_s4 = inlined_call_operand.vmem [shape: f32[16,2], index: 4, kind: output, shape index: {}]  }
   0x1 LB: > { %s1081_s16 = sadd.s32 4294967295, %s1043_s15   ;;  %p781_p0 = scmp.ge.s32.totalorder %s1043_s15, 1  ;;  %s1043_s15 = sphi %s1075_s15, %s15_s15  }
   0x2   : > { %p135_p1 = scmp.lt.s32.totalorder %s1043_s15, 3  ;;  %s1045_s17 = smov [#allocation2]  }
   0x3   : > { %s150_s18 = sshll.u32 %s1045_s17, 4  ;;  %p960_p3 = scmp.eq.s32.totalorder %s1081_s16, 0  ;;  %s151_s18 = int_to_ptr.vmem [resolvable:$true] %s150_s18 }
   0x4   : > { %p1085_p2 = pnand %p781_p0, %p135_p1  ;;  %s1018_s20 = scalar_lea.vmem %s151_s18, 4096 }
   0x5   : > { %p1019_p7 = scmp.ne.s32.totalorder %s151_s18, %s1018_s20  ;;  %p1026_p10 = scmp.lt.s32.totalorder %s151_s18, %s151_s18 }
   0x6   : > { %p956_p4 = pneg %p1085_p2  ;;  %p1027_p11 = scmp.lt.s32.totalorder %s1018_s20, %s1018_s20 }
   0x8   : > { %p957_p5 = pnand %p960_p3, %p956_p4  ;;  %p1028_p12 = por %p1027_p11, %p1026_p10 }
   0xa   : > { %p1009_p6 = pneg %p957_p5 }
   0xc   : > { %p1021_p8 = pnand %p1019_p7, %p1009_p6 }
   0xe   : > { %p1022_p9 = pneg %p1021_p8 }
  0x10   : > { %p1029_p13 = pnand %p1028_p12, %p1022_p9 }
  0x12   : > { %1032 = shalt.err (!%p1029_p13)
}
  0x13   : > { %s1046_s21 = smov 64   ;;  %s1047_s22 = smov 4  }
  0x14   : > { %959 = dma.hbm_to_vmem [thread:$0]  (!%p957_p5), %s1184_s2, 4096, %s151_s18, [#allocation3], %s1046_s21, %s1046_s21, %s1047_s22  }
  0x15   : > { %176 = sbr.rel (%p1085_p2) target bundleno = 1030 (0x406), region = 36 }
  0x1a   : > { %1038 = dma.done.wait (%p960_p3), [#allocation3], 4096  }
  0x1b   : > { %1040 = vsyncadd (%p960_p3), [#allocation3], 4294963200  ;;  %p200_p0 = scmp.lt.s32.totalorder %s1081_s16, 1  ;;  %v1048_v0 = vmov 0.0   ;;  %vm1049_vm0 = vmmov 0   ;;  %vm221_vm1 = vcmask 1041408  }
  0x1c   : > { %866 = vmatprep.subr.bf16.mxu0 %v1048_v0  ;;  %868 = vmatprep.mubr.msk.bf16.mxu0 %vm1049_vm0, %v1048_v0  ;;  %v211_v1 = vld [vmem:[%s1183_s1] sm:$0x3]  ;;  %v975_v5 = vld [vmem:[#allocation2 + $0x38] sm:$0xff]   ;;  %vm217_vm2 = vcmask 31744   ;;  %v976_v6 = vld [vmem:[#allocation2 + $0x30] sm:$0xff]   ;;  %vm712_vm3 = vcmask 15360  }
  0x1d   : > { %s1189_s16 = smov (!%p200_p0, %s1081_s16), 1  ;;  %872 = vmatprep.subr.bf16.mxu1 %v1048_v0  ;;  %888 = vmatprep.mubr.msk.bf16.mxu1 %vm1049_vm0, %v1048_v0  ;;  %v223_v3 = vsel %vm221_vm1, %v211_v1, 0  ;;  %v977_v7 = vld [vmem:[#allocation2 + $0x28] sm:$0xff]   ;;  %v978_v8 = vld [vmem:[#allocation2 + $0x20] sm:$0xff]   ;;  %v979_v9 = vld [vmem:[#allocation2 + $0x18] sm:$0xff]  }
  0x1e   : > { %s786_s25 = sshll.u32 %s1189_s16, 3  ;;  %867 = vmatpush3.bf16.msra.mxu0 %v223_v3  ;;  %873 = vmatpush3.bf16.msra.mxu1 %v975_v5  ;;  %v980_v10 = vld [vmem:[#allocation2 + $0x10] sm:$0xff]   ;;  %v981_v11 = vld [vmem:[#allocation2 + $0x8] sm:$0xff]   ;;  %v982_v12 = vld [vmem:[#allocation2] sm:$0xff]  }
  0x1f   : > { %s203_s28 = scalar_lea.vmem %s1182_s0, %s786_s25  ;;  %892 = vmatprep.subr.bf16.mxu0 %v1048_v0  ;;  %874 = vmatprep.subr.bf16.mxu1 %v1048_v0  ;;  %v983_v13 = vld [vmem:[#allocation2 + $0x78] sm:$0xff]   ;;  %v984_v14 = vld [vmem:[#allocation2 + $0x70] sm:$0xff]   ;;  %v985_v15 = vld [vmem:[#allocation2 + $0x68] sm:$0xff]   ;;  %s207_s19 = scalar_lea.vmem %s1186_s4, %s786_s25 }
  0x20   : > { %v209_v2 = vld [vmem:[%s203_s28] sm:$0xff]  ;;  %v987_v17 = vld [vmem:[#allocation2 + $0x58] sm:$0xff]   ;;  %v988_v18 = vld [vmem:[#allocation2 + $0x50] sm:$0xff]  }
  0x21   : > { %v210_v4 = vpack.c.bf16 %v209_v2, %v209_v2  ;;  %v986_v16 = vld [vmem:[#allocation2 + $0x60] sm:$0xff]   ;;  %v989_v27 = vld [vmem:[#allocation2 + $0x48] sm:$0xff]   ;;  %v991_v29 = vld [vmem:[#allocation2 + $0xb8] sm:$0xff]  }
  0x22   : > { %875 = vmatpush3.bf16.msra.mxu1 %v976_v6  ;;  %v788_v19 = vld [vmem:[%s1185_s3] ss:$0 sm:$0xff]  ;;  %v992_v30 = vld [vmem:[#allocation2 + $0xb0] sm:$0xff]   ;;  %v993_v31 = vld [vmem:[#allocation2 + $0xa8] sm:$0xff]  }
  0x23   : > { %869 = vmatmul.mubr.msk.bf16.vlgmr.msra.gmra.mxu0 %vm217_vm2, %v210_v4  ;;  %876 = vmatprep.subr.bf16.mxu1 %v1048_v0  ;;  %v990_v28 = vld [vmem:[#allocation2 + $0x40] sm:$0xff]   ;;  %v995_v33 = vld [vmem:[#allocation2 + $0x98] sm:$0xff]   ;;  %v996_v34 = vld [vmem:[#allocation2 + $0x90] sm:$0xff]  }
  0x24   : > { %908 = vmatprep.mubr.msk.bf16.mxu0 %vm1049_vm0, %v1048_v0  ;;  %893 = vmatpush3.bf16.msra.mxu0 %v983_v13  ;;  %v994_v32 = vld [vmem:[#allocation2 + $0xa0] sm:$0xff]   ;;  %v997_v43 = vld [vmem:[#allocation2 + $0x88] sm:$0xff]   ;;  %v999_v45 = vld [vmem:[#allocation2 + $0xf8] sm:$0xff]  }
  0x25   : > { %894 = vmatprep.subr.bf16.mxu0 %v1048_v0  ;;  %v790_v35 = vld [vmem:[%s1185_s3 + $0x1] ss:$0 sm:$0xff]  ;;  %v1000_v46 = vld [vmem:[#allocation2 + $0xf0] sm:$0xff]   ;;  %v1001_v47 = vld [vmem:[#allocation2 + $0xe8] sm:$0xff]  }
  0x26   : > { %877 = vmatpush3.bf16.msra.mxu1 %v977_v7  ;;  %v998_v44 = vld [vmem:[#allocation2 + $0x80] sm:$0xff]   ;;  %v1003_v49 = vld [vmem:[#allocation2 + $0xd8] sm:$0xff]   ;;  %v1004_v50 = vld [vmem:[#allocation2 + $0xd0] sm:$0xff]  }
  0x27   : > { %878 = vmatprep.subr.bf16.mxu1 %v1048_v0  ;;  %v1002_v48 = vld [vmem:[#allocation2 + $0xe0] sm:$0xff]   ;;  %v1005_v59 = vld [vmem:[#allocation2 + $0xc8] sm:$0xff]  }
  0x28   : > { %895 = vmatpush3.bf16.msra.mxu0 %v984_v14  ;;  %v799_v51 = vld [vmem:[%s1185_s3 + $0x2] ss:$0 sm:$0xff]  ;;  %v808_v61 = vld [vmem:[%s1185_s3 + $0x3] ss:$0 sm:$0xff]  ;;  %v817_v6 = vld [vmem:[%s1185_s3 + $0x4] ss:$0 sm:$0xff] }
  0x29   : > { %896 = vmatprep.subr.bf16.mxu0 %v1048_v0  ;;  %v1006_v60 = vld [vmem:[#allocation2 + $0xc0] sm:$0xff]  }
  0x2a   : > { %879 = vmatpush3.bf16.msra.mxu1 %v978_v8 }
  0x2b   : > { %880 = vmatprep.subr.bf16.mxu1 %v1048_v0 }
  0x2c   : > { %897 = vmatpush3.bf16.msra.mxu0 %v985_v15 }
  0x2d   : > { %898 = vmatprep.subr.bf16.mxu0 %v1048_v0 }
  0x2e   : > { %881 = vmatpush3.bf16.msra.mxu1 %v979_v9 }
  0x2f   : > { %882 = vmatprep.subr.bf16.mxu1 %v1048_v0 }
  0x30   : > { %899 = vmatpush3.bf16.msra.mxu0 %v986_v16 }
  0x31   : > { %900 = vmatprep.subr.bf16.mxu0 %v1048_v0 }
  0x32   : > { %883 = vmatpush3.bf16.msra.mxu1 %v980_v10 }
  0x33   : > { %884 = vmatprep.subr.bf16.mxu1 %v1048_v0 }
  0x34   : > { %901 = vmatpush3.bf16.msra.mxu0 %v987_v17 }
  0x35   : > { %902 = vmatprep.subr.bf16.mxu0 %v1048_v0 }
  0x36   : > { %885 = vmatpush3.bf16.msra.mxu1 %v981_v11 }
  0x37   : > { %886 = vmatprep.subr.bf16.mxu1 %v1048_v0 }
  0x38   : > { %903 = vmatpush3.bf16.msra.mxu0 %v988_v18 }
  0x39   : > { %904 = vmatprep.subr.bf16.mxu0 %v1048_v0 }
  0x3a   : > { %887 = vmatpush3.bf16.msra.mxu1 %v982_v12 }
  0x3b   : > { %912 = vmatprep.subr.bf16.mxu1 %v1048_v0 }
  0x3c   : > { %905 = vmatpush3.bf16.msra.mxu0 %v989_v27 }
  0x3d   : > { %906 = vmatprep.subr.bf16.mxu0 %v1048_v0 }
  0x40   : > { %907 = vmatpush3.bf16.msra.mxu0 %v990_v28 }
  0x41   : > { %932 = vmatprep.subr.bf16.mxu0 %v1048_v0 }
  0xe3   : > { %v259_v20 = vpop.f32.mrf.mxu0 }
  0xe4   : > { %v260_v21 = vadd.f32 %v788_v19, %v259_v20 }
  0xe5   : > { %v870_v22 = vpop.f32.mrf.mxu0 }
  0xe6   : > { %v265_v23 = vmax.f32 %v260_v21, 0.0 }
  0xe7   : > { %v262_v24 = vpop.f32.mrf.mxu0 }
  0xe8   : > { %v266_v25 = vpack.c.bf16 %v265_v23, %v265_v23 }
  0xe9   : > { %v871_v26 = vpop.f32.mrf.mxu0 }
  0xea   : > { %889 = vmatmul.mubr.bf16.vlgmr.msra.gmra.mxu1 %v266_v25 }
  0xeb   : > { %928 = vmatprep.mubr.msk.bf16.mxu1 %vm1049_vm0, %v1048_v0  ;;  %913 = vmatpush3.bf16.msra.mxu1 %v991_v29 }
  0xec   : > { %914 = vmatprep.subr.bf16.mxu1 %v1048_v0 }
  0xef   : > { %915 = vmatpush3.bf16.msra.mxu1 %v992_v30 }
  0xf0   : > { %916 = vmatprep.subr.bf16.mxu1 %v1048_v0 }
  0xf3   : > { %917 = vmatpush3.bf16.msra.mxu1 %v993_v31 }
  0xf4   : > { %918 = vmatprep.subr.bf16.mxu1 %v1048_v0 }
  0xf7   : > { %919 = vmatpush3.bf16.msra.mxu1 %v994_v32 }
  0xf8   : > { %920 = vmatprep.subr.bf16.mxu1 %v1048_v0 }
  0xfb   : > { %921 = vmatpush3.bf16.msra.mxu1 %v995_v33 }
  0xfc   : > { %922 = vmatprep.subr.bf16.mxu1 %v1048_v0 }
  0xff   : > { %923 = vmatpush3.bf16.msra.mxu1 %v996_v34 }
 0x100   : > { %924 = vmatprep.subr.bf16.mxu1 %v1048_v0 }
 0x103   : > { %925 = vmatpush3.bf16.msra.mxu1 %v997_v43 }
 0x104   : > { %926 = vmatprep.subr.bf16.mxu1 %v1048_v0 }
 0x107   : > { %927 = vmatpush3.bf16.msra.mxu1 %v998_v44 }
 0x1aa   : > { %v370_v36 = vpop.f32.mrf.mxu1 }
 0x1ab   : > { %v371_v37 = vadd.f32 %v790_v35, %v370_v36 }
 0x1ac   : > { %v890_v38 = vpop.f32.mrf.mxu1 }
 0x1ad   : > { %v376_v39 = vmax.f32 %v371_v37, 0.0 }
 0x1ae   : > { %v373_v40 = vpop.f32.mrf.mxu1 }
 0x1af   : > { %v377_v41 = vpack.c.bf16 %v376_v39, %v376_v39 }
 0x1b0   : > { %v891_v42 = vpop.f32.mrf.mxu1 }
 0x1b1   : > { %909 = vmatmul.mubr.bf16.vlgmr.msra.gmra.mxu0 %v377_v41 }
 0x1b2   : > { %948 = vmatprep.mubr.msk.bf16.mxu0 %vm1049_vm0, %v1048_v0  ;;  %933 = vmatpush3.bf16.msra.mxu0 %v999_v45 }
 0x1b3   : > { %934 = vmatprep.subr.bf16.mxu0 %v1048_v0 }
 0x1b6   : > { %935 = vmatpush3.bf16.msra.mxu0 %v1000_v46 }
 0x1b7   : > { %936 = vmatprep.subr.bf16.mxu0 %v1048_v0 }
 0x1ba   : > { %937 = vmatpush3.bf16.msra.mxu0 %v1001_v47 }
 0x1bb   : > { %938 = vmatprep.subr.bf16.mxu0 %v1048_v0 }
 0x1be   : > { %939 = vmatpush3.bf16.msra.mxu0 %v1002_v48 }
 0x1bf   : > { %940 = vmatprep.subr.bf16.mxu0 %v1048_v0 }
 0x1c2   : > { %941 = vmatpush3.bf16.msra.mxu0 %v1003_v49 }
 0x1c3   : > { %942 = vmatprep.subr.bf16.mxu0 %v1048_v0 }
 0x1c6   : > { %943 = vmatpush3.bf16.msra.mxu0 %v1004_v50 }
 0x1c7   : > { %944 = vmatprep.subr.bf16.mxu0 %v1048_v0 }
 0x1ca   : > { %945 = vmatpush3.bf16.msra.mxu0 %v1005_v59 }
 0x1cb   : > { %946 = vmatprep.subr.bf16.mxu0 %v1048_v0 }
 0x1ce   : > { %947 = vmatpush3.bf16.msra.mxu0 %v1006_v60 }
 0x271   : > { %v482_v52 = vpop.f32.mrf.mxu0 }
 0x272   : > { %v483_v53 = vadd.f32 %v799_v51, %v482_v52 }
 0x273   : > { %v910_v54 = vpop.f32.mrf.mxu0 }
 0x274   : > { %v488_v55 = vmax.f32 %v483_v53, 0.0 }
 0x275   : > { %v485_v56 = vpop.f32.mrf.mxu0 }
 0x276   : > { %v489_v57 = vpack.c.bf16 %v488_v55, %v488_v55 }
 0x277   : > { %v911_v58 = vpop.f32.mrf.mxu0 }
 0x278   : > { %929 = vmatmul.mubr.bf16.vlgmr.msra.gmra.mxu1 %v489_v57 }
 0x338   : > { %v594_v62 = vpop.f32.mrf.mxu1 }
 0x339   : > { %v595_v63 = vadd.f32 %v808_v61, %v594_v62 }
 0x33a   : > { %v930_v1 = vpop.f32.mrf.mxu1 }
 0x33b   : > { %v600_v2 = vmax.f32 %v595_v63, 0.0 }
 0x33c   : > { %v597_v3 = vpop.f32.mrf.mxu1 }
 0x33d   : > { %v601_v4 = vpack.c.bf16 %v600_v2, %v600_v2 }
 0x33e   : > { %v931_v5 = vpop.f32.mrf.mxu1 }
 0x33f   : > { %949 = vmatmul.mubr.bf16.vlgmr.msra.gmra.mxu0 %v601_v4 }
 0x3ff   : > { %v706_v0 = vpop.f32.mrf.mxu0 }
 0x400   : > { %v707_v7 = vadd.f32 %v817_v6, %v706_v0 }
 0x401   : > { %v950_v8 = vpop.f32.mrf.mxu0 }
 0x402   : > { %713 = vst.msk [vmem:[%s207_s19] sm:$0xff] %vm712_vm3, %v707_v7 }
 0x403   : > { %v709_v9 = vpop.f32.mrf.mxu0 }
 0x405   : > { %v951_v10 = vpop.f32.mrf.mxu0 }
 0x406 PF: > { %s15_s15 = sadd.s32 1, %s1043_s15  }
 0x407   : > { %p12_p1 = scmp.ge.s32.totalorder %s15_s15, 4  }
 0x409   :  { %14 = sbr.rel (!%p12_p1) target bundleno = 1 (0x1), region = 74 }
 0x40e   :  { %733 = vsyncpa [#allocation3], 1 }
 0x40f   :  { %735 = vsyncpa [#allocation3 + $0x1], 1 }

</bundles_post_ra>
